<compile_context>
chip_gen: v5e
topology: v5e:2x2
jax: 0.10.0
libtpu: 0.0.40
codegen_flags: <defaults>
</compile_context>

<pallas_src>
import math

import jax
import jax.numpy as jnp
from jax import lax
from jax.experimental import pallas as pl
from jax.experimental.pallas import tpu as pltpu
import numpy as np


def _mha_kernel(q_ref, k_ref, v_ref,
                wq_ref, bq_ref, wk_ref, bk_ref, wv_ref, bv_ref,
                wo_ref, bo_ref, gamma_ref, beta_ref,
                out_ref, attn_ref, acc_ref):
    """One (batch, q-tile, head) step.  Grid: (B, Nq//tq, H), H innermost."""
    h = pl.program_id(2)
    last_h = pl.num_programs(2) - 1

    c = wq_ref.shape[-1]                      # head dim (static)
    scale = 1.0 / math.sqrt(c)

    @pl.when(h == 0)
    def _():
        acc_ref[...] = jnp.zeros_like(acc_ref)

    xq = q_ref[0]                             # (tq, E)  bf16
    xk = k_ref[0]                             # (Nk, E)  bf16
    xv = v_ref[0]                             # (Nk, E)  bf16

    # Per-head projections: bf16 operands on the MXU, f32 accumulation + bias.
    qh = jnp.dot(xq, wq_ref[0], preferred_element_type=jnp.float32) + bq_ref[0]
    kh = jnp.dot(xk, wk_ref[0], preferred_element_type=jnp.float32) + bk_ref[0]
    vh = jnp.dot(xv, wv_ref[0], preferred_element_type=jnp.float32) + bv_ref[0]

    # Scores: contract the head dim of q and k directly (q @ k^T without an
    # XLU transpose of k).
    s = lax.dot_general(
        qh.astype(jnp.bfloat16), kh.astype(jnp.bfloat16),
        (((1,), (1,)), ((), ())),
        preferred_element_type=jnp.float32) * scale          # (tq, Nk) f32

    # Pre-softmax scores returned by the module (attn_out).  Lane-dense iff Nk
    # is a multiple of 128 (true for SAM image tokens); for tiny Nk the store
    # is necessarily masked.
    attn_ref[0, 0] = s.astype(attn_ref.dtype)

    # Softmax over keys in f32; approximate reciprocal runs on the EUP slot.
    m = jnp.max(s, axis=-1, keepdims=True)
    e = jnp.exp(s - m)
    p = e * pl.reciprocal(jnp.sum(e, axis=-1, keepdims=True), approx=True)

    o_h = jnp.dot(p.astype(jnp.bfloat16), vh.astype(jnp.bfloat16),
                  preferred_element_type=jnp.float32)        # (tq, c) f32

    # Output projection distributed over heads (replaces concat + one matmul):
    #   concat_h(o_h) @ Wo  ==  sum_h  o_h @ Wo[h*c:(h+1)*c, :]
    acc_ref[...] += jnp.dot(o_h.astype(jnp.bfloat16), wo_ref[0],
                            preferred_element_type=jnp.float32)   # (tq, E)

    @pl.when(h == last_h)
    def _():
        o = acc_ref[...] + bo_ref[...]
        # TODO(synk): nn.Dropout is identity in eval mode; training-mode
        # dropout is not modeled.
        # LayerNorm over the embedding dim, eps=1e-6, biased variance (torch).
        mean = jnp.mean(o, axis=-1, keepdims=True)
        var = jnp.mean((o - mean) ** 2, axis=-1, keepdims=True)
        o = (o - mean) * lax.rsqrt(var + 1e-6)
        o = o * gamma_ref[...] + beta_ref[...]
        out_ref[0] = o.astype(out_ref.dtype)


def muti_head_attention(q, k, v, params, num_heads, *, attn_dtype=jnp.float32):
    """q: (B, Nq, E), k/v: (B, Nk, E).  Returns (out1[0], attn_out[0]),
    exactly like the PyTorch module (eval mode, use_attention_mask=False)."""
    # The module discards every batch element except 0 — don't compute them.
    q, k, v = q[:1], k[:1], v[:1]
    out_dtype = q.dtype

    B, Nq, E = q.shape
    _, Nk, _ = k.shape
    D = params["wq"].shape[1]                 # internal_dim
    H = num_heads
    assert D % H == 0, "num_heads must divide internal_dim"
    c = D // H

    # q-tile size: largest 8-multiple (<=256) dividing Nq.  256 keeps the
    # double-buffered (tq, Nk) f32 score tile + q/k/v/weight buffers inside the
    # tighter v7x VMEM budget (64 MiB physical / 32 MiB scoped) at SAM-scale Nk.
    tq = Nq
    for cand in (256, 128, 64, 32, 16, 8):
        if Nq % cand == 0:
            tq = cand
            break

    # bf16 operands for the MXU (accumulation stays f32 in-kernel); biases and
    # LayerNorm params stay f32.
    qb = q.astype(jnp.bfloat16)
    kb = k.astype(jnp.bfloat16)
    vb = v.astype(jnp.bfloat16)

    # Head-major weight layout, reshaped once on the host (no in-kernel
    # relayout / masked lane slices):
    #   wq (E, D) -> (H, E, c),  wo (D, E) -> (H, c, E),  biases (1, D) -> (H, 1, c)
    def in_proj_w(w):
        return jnp.transpose(w.reshape(E, H, c), (1, 0, 2)).astype(jnp.bfloat16)

    def in_proj_b(b):
        return b.reshape(H, 1, c).astype(jnp.float32)

    wq_h, bq_h = in_proj_w(params["wq"]), in_proj_b(params["bq"])
    wk_h, bk_h = in_proj_w(params["wk"]), in_proj_b(params["bk"])
    wv_h, bv_h = in_proj_w(params["wv"]), in_proj_b(params["bv"])
    wo_h = params["wo"].reshape(H, c, E).astype(jnp.bfloat16)
    bo = params["bo"].astype(jnp.float32)
    gamma = params["gamma"].astype(jnp.float32)
    beta = params["beta"].astype(jnp.float32)

    grid = (B, Nq // tq, H)

    head_w = lambda b, qi, h: (h, 0, 0)
    const2 = lambda b, qi, h: (0, 0)

    in_specs = [
        pl.BlockSpec((1, tq, E), lambda b, qi, h: (b, qi, 0)),   # q tile
        pl.BlockSpec((1, Nk, E), lambda b, qi, h: (b, 0, 0)),    # k
        pl.BlockSpec((1, Nk, E), lambda b, qi, h: (b, 0, 0)),    # v
        pl.BlockSpec((1, E, c), head_w),                         # wq[h]
        pl.BlockSpec((1, 1, c), head_w),                         # bq[h]
        pl.BlockSpec((1, E, c), head_w),                         # wk[h]
        pl.BlockSpec((1, 1, c), head_w),                         # bk[h]
        pl.BlockSpec((1, E, c), head_w),                         # wv[h]
        pl.BlockSpec((1, 1, c), head_w),                         # bv[h]
        pl.BlockSpec((1, c, E), head_w),                         # wo[h]
        pl.BlockSpec((1, E), const2),                            # bo
        pl.BlockSpec((1, E), const2),                            # gamma
        pl.BlockSpec((1, E), const2),                            # beta
    ]
    # NOTE: on v7x the constant-index bias/gamma/beta blocks could additionally
    # use pipeline_mode=pl.Buffered(1) to reclaim VMEM for bigger q tiles.
    out_specs = (
        pl.BlockSpec((1, tq, E), lambda b, qi, h: (b, qi, 0)),        # out1
        pl.BlockSpec((1, 1, tq, Nk), lambda b, qi, h: (b, h, qi, 0)),  # attn
    )
    out_shapes = (
        jax.ShapeDtypeStruct((B, Nq, E), out_dtype),
        # attn_dtype=jnp.bfloat16 halves the score writeback when bf16
        # pre-softmax scores are acceptable; default f32 matches the module.
        jax.ShapeDtypeStruct((B, H, Nq, Nk), attn_dtype),
    )

    out1, attn_out = pl.pallas_call(
        _mha_kernel,
        out_shape=out_shapes,
        grid=grid,
        in_specs=in_specs,
        out_specs=out_specs,
        scratch_shapes=[pltpu.VMEM((tq, E), jnp.float32)],
        compiler_params=pltpu.CompilerParams(
            dimension_semantics=("parallel", "parallel", "arbitrary"),
            vmem_limit_bytes=32 * 1024 * 1024),
    )(qb, kb, vb,
      wq_h, bq_h, wk_h, bk_h, wv_h, bv_h,
      wo_h, bo, gamma, beta)

    return out1[0], attn_out[0]


def _reference(q, k, v, params, num_heads):
    """Pure-JAX f32 reference mirroring the PyTorch forward (eval mode)."""
    D = params["wq"].shape[1]
    B, Nq, E = q.shape
    c = D // num_heads

    qp = q @ params["wq"] + params["bq"][0]
    kp = k @ params["wk"] + params["bk"][0]
    vp = v @ params["wv"] + params["bv"][0]

    sep = lambda x: x.reshape(B, -1, num_heads, c).transpose(0, 2, 1, 3)
    qh, kh, vh = sep(qp), sep(kp), sep(vp)

    attn = jnp.einsum("bhqc,bhkc->bhqk", qh, kh) / math.sqrt(c)
    attn_out = attn
    p = jax.nn.softmax(attn, axis=-1)
    o = jnp.einsum("bhqk,bhkc->bhqc", p, vh)
    o = o.transpose(0, 2, 1, 3).reshape(B, Nq, D)
    o = o @ params["wo"] + params["bo"][0]
    mean = jnp.mean(o, axis=-1, keepdims=True)
    var = jnp.mean((o - mean) ** 2, axis=-1, keepdims=True)
    o = (o - mean) / jnp.sqrt(var + 1e-6)
    o = o * params["gamma"][0] + params["beta"][0]
    return o[0], attn_out[0]


if __name__ == "__main__":
    # Small, module-consistent shapes.
    B, Nq, Nk = 2, 8, 8
    embedding_dim = 32
    num_heads = 4
    downsample_rate = 1
    internal_dim = embedding_dim // downsample_rate
    # TODO(synk): the n_masked_patch / use_attention_mask branch uses
    # torch.rand/topk/scatter (random top-k masking); only the default path
    # (use_attention_mask=False) is implemented.

    key = jax.random.PRNGKey(0)
    keys = jax.random.split(key, 16)

    def lin(kw, kb, fan_in, fan_out):
        bound = 1.0 / math.sqrt(fan_in)
        w = jax.random.uniform(kw, (fan_in, fan_out), jnp.float32, -bound, bound)
        b = jax.random.uniform(kb, (1, fan_out), jnp.float32, -bound, bound)
        return w, b

    wq, bq = lin(keys[0], keys[1], embedding_dim, internal_dim)
    wk, bk = lin(keys[2], keys[3], embedding_dim, internal_dim)
    wv, bv = lin(keys[4], keys[5], embedding_dim, internal_dim)
    wo, bo = lin(keys[6], keys[7], internal_dim, embedding_dim)
    params = dict(
        wq=wq, bq=bq, wk=wk, bk=bk, wv=wv, bv=bv, wo=wo, bo=bo,
        gamma=jnp.ones((1, embedding_dim), jnp.float32),
        beta=jnp.zeros((1, embedding_dim), jnp.float32),
    )

    q = jax.random.normal(keys[8], (B, Nq, embedding_dim), jnp.float32)
    k = jax.random.normal(keys[9], (B, Nk, embedding_dim), jnp.float32)
    v = jax.random.normal(keys[10], (B, Nk, embedding_dim), jnp.float32)

    out1, attn_out = muti_head_attention(q, k, v, params, num_heads)
    jax.block_until_ready((out1, attn_out))

    ref_out1, ref_attn = _reference(q, k, v, params, num_heads)

    # Tolerances account for bf16 MXU operands (f32 accumulation) in the kernel
    # vs. the pure-f32 reference.
    np.testing.assert_allclose(np.asarray(attn_out), np.asarray(ref_attn),
                               rtol=2e-2, atol=2e-2)
    np.testing.assert_allclose(np.asarray(out1), np.asarray(ref_out1),
                               rtol=5e-2, atol=5e-2)

    print("KERNEL_OK")
</pallas_src>

<mosaic_0001>
module attributes {stable_mosaic.version = 11 : i64} {
  func.func @_mha_kernel(%arg0: i32, %arg1: i32, %arg2: i32, %arg3: memref<1x8x32xbf16, #tpu.memory_space<vmem>>, %arg4: memref<1x8x32xbf16, #tpu.memory_space<vmem>>, %arg5: memref<1x8x32xbf16, #tpu.memory_space<vmem>>, %arg6: memref<1x32x8xbf16, #tpu.memory_space<vmem>>, %arg7: memref<1x1x8xf32, #tpu.memory_space<vmem>>, %arg8: memref<1x32x8xbf16, #tpu.memory_space<vmem>>, %arg9: memref<1x1x8xf32, #tpu.memory_space<vmem>>, %arg10: memref<1x32x8xbf16, #tpu.memory_space<vmem>>, %arg11: memref<1x1x8xf32, #tpu.memory_space<vmem>>, %arg12: memref<1x8x32xbf16, #tpu.memory_space<vmem>>, %arg13: memref<1x32xf32, #tpu.memory_space<vmem>>, %arg14: memref<1x32xf32, #tpu.memory_space<vmem>>, %arg15: memref<1x32xf32, #tpu.memory_space<vmem>>, %arg16: memref<1x8x32xf32, #tpu.memory_space<vmem>>, %arg17: memref<1x1x8x8xf32, #tpu.memory_space<vmem>>, %arg18: memref<8x32xf32, #tpu.memory_space<vmem>>) attributes {dimension_semantics = [#tpu.dimension_semantics<parallel>, #tpu.dimension_semantics<parallel>, #tpu.dimension_semantics<arbitrary>], iteration_bounds = array<i64: 1, 1, 4>, scalar_prefetch = 0 : i64, scratch_operands = 1 : i64, tpu.core_type = #tpu.core_type<tc>, window_params = [{transform_indices = @transform_0, window_bounds = array<i64: 1, 8, 32>}, {transform_indices = @transform_1, window_bounds = array<i64: 1, 8, 32>}, {transform_indices = @transform_2, window_bounds = array<i64: 1, 8, 32>}, {transform_indices = @transform_3, window_bounds = array<i64: 1, 32, 8>}, {transform_indices = @transform_4, window_bounds = array<i64: 1, 1, 8>}, {transform_indices = @transform_5, window_bounds = array<i64: 1, 32, 8>}, {transform_indices = @transform_6, window_bounds = array<i64: 1, 1, 8>}, {transform_indices = @transform_7, window_bounds = array<i64: 1, 32, 8>}, {transform_indices = @transform_8, window_bounds = array<i64: 1, 1, 8>}, {transform_indices = @transform_9, window_bounds = array<i64: 1, 8, 32>}, {pipeline_mode = #tpu.pipeline_mode<synchronous>, transform_indices = @transform_10, window_bounds = array<i64: 1, 32>}, {pipeline_mode = #tpu.pipeline_mode<synchronous>, transform_indices = @transform_11, window_bounds = array<i64: 1, 32>}, {pipeline_mode = #tpu.pipeline_mode<synchronous>, transform_indices = @transform_12, window_bounds = array<i64: 1, 32>}, {transform_indices = @transform_13, window_bounds = array<i64: 1, 8, 32>}, {transform_indices = @transform_14, window_bounds = array<i64: 1, 1, 8, 8>}]} {
    %c0_i32 = arith.constant 0 : i32
    %0 = arith.cmpi eq, %arg2, %c0_i32 : i32
    %1 = arith.extui %0 : i1 to i32
    %c0_i32_0 = arith.constant 0 : i32
    %2 = arith.cmpi ne, %1, %c0_i32_0 : i32
    scf.if %2 {
      %cst_47 = arith.constant 0.000000e+00 : f32
      %61 = vector.broadcast %cst_47 : f32 to vector<8x32xf32>
      %c0_48 = arith.constant 0 : index
      %c0_49 = arith.constant 0 : index
      %62 = vector.load %arg18[%c0_48, %c0_49] : memref<8x32xf32, #tpu.memory_space<vmem>>, vector<8x32xf32>
      tpu.vector_store %arg18[%c0_48, %c0_49], %61 {strides = array<i32>} : memref<8x32xf32, #tpu.memory_space<vmem>>, vector<8x32xf32>,
    } else {
    }
    %c0 = arith.constant 0 : index
    %c0_1 = arith.constant 0 : index
    %c0_2 = arith.constant 0 : index
    %3 = vector.load %arg3[%c0, %c0_1, %c0_2] : memref<1x8x32xbf16, #tpu.memory_space<vmem>>, vector<1x8x32xbf16>
    %4 = vector.shape_cast %3 : vector<1x8x32xbf16> to vector<8x32xbf16>
    %c0_3 = arith.constant 0 : index
    %c0_4 = arith.constant 0 : index
    %c0_5 = arith.constant 0 : index
    %5 = vector.load %arg4[%c0_3, %c0_4, %c0_5] : memref<1x8x32xbf16, #tpu.memory_space<vmem>>, vector<1x8x32xbf16>
    %6 = vector.shape_cast %5 : vector<1x8x32xbf16> to vector<8x32xbf16>
    %c0_6 = arith.constant 0 : index
    %c0_7 = arith.constant 0 : index
    %c0_8 = arith.constant 0 : index
    %7 = vector.load %arg5[%c0_6, %c0_7, %c0_8] : memref<1x8x32xbf16, #tpu.memory_space<vmem>>, vector<1x8x32xbf16>
    %8 = vector.shape_cast %7 : vector<1x8x32xbf16> to vector<8x32xbf16>
    %c0_9 = arith.constant 0 : index
    %c0_10 = arith.constant 0 : index
    %c0_11 = arith.constant 0 : index
    %9 = vector.load %arg6[%c0_9, %c0_10, %c0_11] : memref<1x32x8xbf16, #tpu.memory_space<vmem>>, vector<1x32x8xbf16>
    %10 = vector.shape_cast %9 : vector<1x32x8xbf16> to vector<32x8xbf16>
    %cst = arith.constant dense<0.000000e+00> : vector<8x8xf32>
    %11 = tpu.matmul %4, %10, %cst {dimension_numbers = #tpu.dot_dimension_numbers<[1], [0], [0], [1], [0, 0, 1, 1], [], []>} : vector<8x32xbf16>, vector<32x8xbf16>, vector<8x8xf32> -> vector<8x8xf32>
    %c0_12 = arith.constant 0 : index
    %c0_13 = arith.constant 0 : index
    %c0_14 = arith.constant 0 : index
    %12 = vector.load %arg7[%c0_12, %c0_13, %c0_14] : memref<1x1x8xf32, #tpu.memory_space<vmem>>, vector<1x1x8xf32>
    %13 = vector.shape_cast %12 : vector<1x1x8xf32> to vector<1x8xf32>
    %14 = vector.broadcast %13 : vector<1x8xf32> to vector<8x8xf32>
    %15 = arith.addf %11, %14 : vector<8x8xf32>
    %c0_15 = arith.constant 0 : index
    %c0_16 = arith.constant 0 : index
    %c0_17 = arith.constant 0 : index
    %16 = vector.load %arg8[%c0_15, %c0_16, %c0_17] : memref<1x32x8xbf16, #tpu.memory_space<vmem>>, vector<1x32x8xbf16>
    %17 = vector.shape_cast %16 : vector<1x32x8xbf16> to vector<32x8xbf16>
    %cst_18 = arith.constant dense<0.000000e+00> : vector<8x8xf32>
    %18 = tpu.matmul %6, %17, %cst_18 {dimension_numbers = #tpu.dot_dimension_numbers<[1], [0], [0], [1], [0, 0, 1, 1], [], []>} : vector<8x32xbf16>, vector<32x8xbf16>, vector<8x8xf32> -> vector<8x8xf32>
    %c0_19 = arith.constant 0 : index
    %c0_20 = arith.constant 0 : index
    %c0_21 = arith.constant 0 : index
    %19 = vector.load %arg9[%c0_19, %c0_20, %c0_21] : memref<1x1x8xf32, #tpu.memory_space<vmem>>, vector<1x1x8xf32>
    %20 = vector.shape_cast %19 : vector<1x1x8xf32> to vector<1x8xf32>
    %21 = vector.broadcast %20 : vector<1x8xf32> to vector<8x8xf32>
    %22 = arith.addf %18, %21 : vector<8x8xf32>
    %c0_22 = arith.constant 0 : index
    %c0_23 = arith.constant 0 : index
    %c0_24 = arith.constant 0 : index
    %23 = vector.load %arg10[%c0_22, %c0_23, %c0_24] : memref<1x32x8xbf16, #tpu.memory_space<vmem>>, vector<1x32x8xbf16>
    %24 = vector.shape_cast %23 : vector<1x32x8xbf16> to vector<32x8xbf16>
    %cst_25 = arith.constant dense<0.000000e+00> : vector<8x8xf32>
    %25 = tpu.matmul %8, %24, %cst_25 {dimension_numbers = #tpu.dot_dimension_numbers<[1], [0], [0], [1], [0, 0, 1, 1], [], []>} : vector<8x32xbf16>, vector<32x8xbf16>, vector<8x8xf32> -> vector<8x8xf32>
    %c0_26 = arith.constant 0 : index
    %c0_27 = arith.constant 0 : index
    %c0_28 = arith.constant 0 : index
    %26 = vector.load %arg11[%c0_26, %c0_27, %c0_28] : memref<1x1x8xf32, #tpu.memory_space<vmem>>, vector<1x1x8xf32>
    %27 = vector.shape_cast %26 : vector<1x1x8xf32> to vector<1x8xf32>
    %28 = vector.broadcast %27 : vector<1x8xf32> to vector<8x8xf32>
    %29 = arith.addf %25, %28 : vector<8x8xf32>
    %30 = arith.truncf %15 : vector<8x8xf32> to vector<8x8xbf16>
    %31 = arith.truncf %22 : vector<8x8xf32> to vector<8x8xbf16>
    %cst_29 = arith.constant dense<0.000000e+00> : vector<8x8xf32>
    %32 = tpu.matmul %30, %31, %cst_29 {dimension_numbers = #tpu.dot_dimension_numbers<[1], [1], [0], [0], [0, 0, 1, 0], [], []>} : vector<8x8xbf16>, vector<8x8xbf16>, vector<8x8xf32> -> vector<8x8xf32>
    %cst_30 = arith.constant 0.353553385 : f32
    %33 = vector.broadcast %cst_30 : f32 to vector<8x8xf32>
    %34 = arith.mulf %32, %33 : vector<8x8xf32>
    %c0_31 = arith.constant 0 : index
    %c0_32 = arith.constant 0 : index
    %c0_33 = arith.constant 0 : index
    %c0_34 = arith.constant 0 : index
    %35 = vector.load %arg17[%c0_31, %c0_32, %c0_33, %c0_34] : memref<1x1x8x8xf32, #tpu.memory_space<vmem>>, vector<1x1x8x8xf32>
    %36 = vector.shape_cast %35 : vector<1x1x8x8xf32> to vector<8x8xf32>
    %37 = vector.shape_cast %34 : vector<8x8xf32> to vector<1x1x8x8xf32>
    tpu.vector_store %arg17[%c0_31, %c0_32, %c0_33, %c0_34], %37 {strides = array<i32>} : memref<1x1x8x8xf32, #tpu.memory_space<vmem>>, vector<1x1x8x8xf32>,
    %cst_35 = arith.constant dense<0xFF800000> : vector<8xf32>
    %38 = vector.multi_reduction <maximumf>, %34, %cst_35 [1] : vector<8x8xf32> to vector<8xf32>
    %39 = vector.shape_cast %38 : vector<8xf32> to vector<8x1xf32>
    %40 = vector.broadcast %39 : vector<8x1xf32> to vector<8x8xf32>
    %41 = arith.subf %34, %40 : vector<8x8xf32>
    %42 = math.exp %41 : vector<8x8xf32>
    %cst_36 = arith.constant dense<0.000000e+00> : vector<8xf32>
    %43 = vector.multi_reduction <add>, %42, %cst_36 [1] : vector<8x8xf32> to vector<8xf32>
    %44 = vector.shape_cast %43 : vector<8xf32> to vector<8x1xf32>
    %45 = tpu.reciprocal %44 {approx = true} : vector<8x1xf32> -> vector<8x1xf32>
    %46 = vector.broadcast %45 : vector<8x1xf32> to vector<8x8xf32>
    %47 = arith.mulf %42, %46 : vector<8x8xf32>
    %48 = arith.truncf %47 : vector<8x8xf32> to vector<8x8xbf16>
    %49 = arith.truncf %29 : vector<8x8xf32> to vector<8x8xbf16>
    %cst_37 = arith.constant dense<0.000000e+00> : vector<8x8xf32>
    %50 = tpu.matmul %48, %49, %cst_37 {dimension_numbers = #tpu.dot_dimension_numbers<[1], [0], [0], [1], [0, 0, 1, 1], [], []>} : vector<8x8xbf16>, vector<8x8xbf16>, vector<8x8xf32> -> vector<8x8xf32>
    %c0_38 = arith.constant 0 : index
    %c0_39 = arith.constant 0 : index
    %51 = vector.load %arg18[%c0_38, %c0_39] : memref<8x32xf32, #tpu.memory_space<vmem>>, vector<8x32xf32>
    %52 = arith.truncf %50 : vector<8x8xf32> to vector<8x8xbf16>
    %c0_40 = arith.constant 0 : index
    %c0_41 = arith.constant 0 : index
    %c0_42 = arith.constant 0 : index
    %53 = vector.load %arg12[%c0_40, %c0_41, %c0_42] : memref<1x8x32xbf16, #tpu.memory_space<vmem>>, vector<1x8x32xbf16>
    %54 = vector.shape_cast %53 : vector<1x8x32xbf16> to vector<8x32xbf16>
    %cst_43 = arith.constant dense<0.000000e+00> : vector<8x32xf32>
    %55 = tpu.matmul %52, %54, %cst_43 {dimension_numbers = #tpu.dot_dimension_numbers<[1], [0], [0], [1], [0, 0, 1, 1], [], []>} : vector<8x8xbf16>, vector<8x32xbf16>, vector<8x32xf32> -> vector<8x32xf32>
    %56 = arith.addf %51, %55 : vector<8x32xf32>
    %c0_44 = arith.constant 0 : index
    %c0_45 = arith.constant 0 : index
    %57 = vector.load %arg18[%c0_44, %c0_45] : memref<8x32xf32, #tpu.memory_space<vmem>>, vector<8x32xf32>
    tpu.vector_store %arg18[%c0_44, %c0_45], %56 {strides = array<i32>} : memref<8x32xf32, #tpu.memory_space<vmem>>, vector<8x32xf32>,
    %c3_i32 = arith.constant 3 : i32
    %58 = arith.cmpi eq, %arg2, %c3_i32 : i32
    %59 = arith.extui %58 : i1 to i32
    %c0_i32_46 = arith.constant 0 : i32
    %60 = arith.cmpi ne, %59, %c0_i32_46 : i32
    scf.if %60 {
      %c0_47 = arith.constant 0 : index
      %c0_48 = arith.constant 0 : index
      %61 = vector.load %arg18[%c0_47, %c0_48] : memref<8x32xf32, #tpu.memory_space<vmem>>, vector<8x32xf32>
      %c0_49 = arith.constant 0 : index
      %c0_50 = arith.constant 0 : index
      %62 = vector.load %arg13[%c0_49, %c0_50] : memref<1x32xf32, #tpu.memory_space<vmem>>, vector<1x32xf32>
      %63 = vector.broadcast %62 : vector<1x32xf32> to vector<8x32xf32>
      %64 = arith.addf %61, %63 : vector<8x32xf32>
      %cst_51 = arith.constant dense<0.000000e+00> : vector<8xf32>
      %65 = vector.multi_reduction <add>, %64, %cst_51 [1] : vector<8x32xf32> to vector<8xf32>
      %66 = vector.shape_cast %65 : vector<8xf32> to vector<8x1xf32>
      %cst_52 = arith.constant 3.200000e+01 : f32
      %67 = vector.broadcast %cst_52 : f32 to vector<8x1xf32>
      %68 = arith.divf %66, %67 : vector<8x1xf32>
      %69 = vector.broadcast %68 : vector<8x1xf32> to vector<8x32xf32>
      %70 = arith.subf %64, %69 : vector<8x32xf32>
      %71 = arith.mulf %70, %70 : vector<8x32xf32>
      %cst_53 = arith.constant dense<0.000000e+00> : vector<8xf32>
      %72 = vector.multi_reduction <add>, %71, %cst_53 [1] : vector<8x32xf32> to vector<8xf32>
      %73 = vector.shape_cast %72 : vector<8xf32> to vector<8x1xf32>
      %cst_54 = arith.constant 3.200000e+01 : f32
      %74 = vector.broadcast %cst_54 : f32 to vector<8x1xf32>
      %75 = arith.divf %73, %74 : vector<8x1xf32>
      %76 = vector.broadcast %68 : vector<8x1xf32> to vector<8x32xf32>
      %77 = arith.subf %64, %76 : vector<8x32xf32>
      %cst_55 = arith.constant 9.99999997E-7 : f32
      %78 = vector.broadcast %cst_55 : f32 to vector<8x1xf32>
      %79 = arith.addf %75, %78 : vector<8x1xf32>
      %80 = math.rsqrt %79 : vector<8x1xf32>
      %81 = vector.broadcast %80 : vector<8x1xf32> to vector<8x32xf32>
      %82 = arith.mulf %77, %81 : vector<8x32xf32>
      %c0_56 = arith.constant 0 : index
      %c0_57 = arith.constant 0 : index
      %83 = vector.load %arg14[%c0_56, %c0_57] : memref<1x32xf32, #tpu.memory_space<vmem>>, vector<1x32xf32>
      %84 = vector.broadcast %83 : vector<1x32xf32> to vector<8x32xf32>
      %85 = arith.mulf %82, %84 : vector<8x32xf32>
      %c0_58 = arith.constant 0 : index
      %c0_59 = arith.constant 0 : index
      %86 = vector.load %arg15[%c0_58, %c0_59] : memref<1x32xf32, #tpu.memory_space<vmem>>, vector<1x32xf32>
      %87 = vector.broadcast %86 : vector<1x32xf32> to vector<8x32xf32>
      %88 = arith.addf %85, %87 : vector<8x32xf32>
      %c0_60 = arith.constant 0 : index
      %c0_61 = arith.constant 0 : index
      %c0_62 = arith.constant 0 : index
      %89 = vector.load %arg16[%c0_60, %c0_61, %c0_62] : memref<1x8x32xf32, #tpu.memory_space<vmem>>, vector<1x8x32xf32>
      %90 = vector.shape_cast %89 : vector<1x8x32xf32> to vector<8x32xf32>
      %91 = vector.shape_cast %88 : vector<8x32xf32> to vector<1x8x32xf32>
      tpu.vector_store %arg16[%c0_60, %c0_61, %c0_62], %91 {strides = array<i32>} : memref<1x8x32xf32, #tpu.memory_space<vmem>>, vector<1x8x32xf32>,
    } else {
    }
    return
  }
  func.func @transform_0(%arg0: i32, %arg1: i32, %arg2: i32) -> (i32, i32, i32) {
    %c0_i32 = arith.constant 0 : i32
    %c0_i32_0 = arith.constant 0 : i32
    return %arg0, %arg1, %c0_i32 : i32, i32, i32
  }
  func.func @transform_1(%arg0: i32, %arg1: i32, %arg2: i32) -> (i32, i32, i32) {
    %c0_i32 = arith.constant 0 : i32
    %c0_i32_0 = arith.constant 0 : i32
    %c0_i32_1 = arith.constant 0 : i32
    return %arg0, %c0_i32, %c0_i32_0 : i32, i32, i32
  }
  func.func @transform_2(%arg0: i32, %arg1: i32, %arg2: i32) -> (i32, i32, i32) {
    %c0_i32 = arith.constant 0 : i32
    %c0_i32_0 = arith.constant 0 : i32
    %c0_i32_1 = arith.constant 0 : i32
    return %arg0, %c0_i32, %c0_i32_0 : i32, i32, i32
  }
  func.func @transform_3(%arg0: i32, %arg1: i32, %arg2: i32) -> (i32, i32, i32) {
    %c0_i32 = arith.constant 0 : i32
    %c0_i32_0 = arith.constant 0 : i32
    %c0_i32_1 = arith.constant 0 : i32
    return %arg2, %c0_i32, %c0_i32_0 : i32, i32, i32
  }
  func.func @transform_4(%arg0: i32, %arg1: i32, %arg2: i32) -> (i32, i32, i32) {
    %c0_i32 = arith.constant 0 : i32
    %c0_i32_0 = arith.constant 0 : i32
    %c0_i32_1 = arith.constant 0 : i32
    return %arg2, %c0_i32, %c0_i32_0 : i32, i32, i32
  }
  func.func @transform_5(%arg0: i32, %arg1: i32, %arg2: i32) -> (i32, i32, i32) {
    %c0_i32 = arith.constant 0 : i32
    %c0_i32_0 = arith.constant 0 : i32
    %c0_i32_1 = arith.constant 0 : i32
    return %arg2, %c0_i32, %c0_i32_0 : i32, i32, i32
  }
  func.func @transform_6(%arg0: i32, %arg1: i32, %arg2: i32) -> (i32, i32, i32) {
    %c0_i32 = arith.constant 0 : i32
    %c0_i32_0 = arith.constant 0 : i32
    %c0_i32_1 = arith.constant 0 : i32
    return %arg2, %c0_i32, %c0_i32_0 : i32, i32, i32
  }
  func.func @transform_7(%arg0: i32, %arg1: i32, %arg2: i32) -> (i32, i32, i32) {
    %c0_i32 = arith.constant 0 : i32
    %c0_i32_0 = arith.constant 0 : i32
    %c0_i32_1 = arith.constant 0 : i32
    return %arg2, %c0_i32, %c0_i32_0 : i32, i32, i32
  }
  func.func @transform_8(%arg0: i32, %arg1: i32, %arg2: i32) -> (i32, i32, i32) {
    %c0_i32 = arith.constant 0 : i32
    %c0_i32_0 = arith.constant 0 : i32
    %c0_i32_1 = arith.constant 0 : i32
    return %arg2, %c0_i32, %c0_i32_0 : i32, i32, i32
  }
  func.func @transform_9(%arg0: i32, %arg1: i32, %arg2: i32) -> (i32, i32, i32) {
    %c0_i32 = arith.constant 0 : i32
    %c0_i32_0 = arith.constant 0 : i32
    %c0_i32_1 = arith.constant 0 : i32
    return %arg2, %c0_i32, %c0_i32_0 : i32, i32, i32
  }
  func.func @transform_10(%arg0: i32, %arg1: i32, %arg2: i32) -> (i32, i32) {
    %c0_i32 = arith.constant 0 : i32
    %c0_i32_0 = arith.constant 0 : i32
    %c0_i32_1 = arith.constant 0 : i32
    return %c0_i32, %c0_i32_0 : i32, i32
  }
  func.func @transform_11(%arg0: i32, %arg1: i32, %arg2: i32) -> (i32, i32) {
    %c0_i32 = arith.constant 0 : i32
    %c0_i32_0 = arith.constant 0 : i32
    %c0_i32_1 = arith.constant 0 : i32
    return %c0_i32, %c0_i32_0 : i32, i32
  }
  func.func @transform_12(%arg0: i32, %arg1: i32, %arg2: i32) -> (i32, i32) {
    %c0_i32 = arith.constant 0 : i32
    %c0_i32_0 = arith.constant 0 : i32
    %c0_i32_1 = arith.constant 0 : i32
    return %c0_i32, %c0_i32_0 : i32, i32
  }
  func.func @transform_13(%arg0: i32, %arg1: i32, %arg2: i32) -> (i32, i32, i32) {
    %c0_i32 = arith.constant 0 : i32
    %c0_i32_0 = arith.constant 0 : i32
    return %arg0, %arg1, %c0_i32 : i32, i32, i32
  }
  func.func @transform_14(%arg0: i32, %arg1: i32, %arg2: i32) -> (i32, i32, i32, i32) {
    %c0_i32 = arith.constant 0 : i32
    %c0_i32_0 = arith.constant 0 : i32
    return %arg0, %arg2, %arg1, %c0_i32 : i32, i32, i32, i32
  }
}

</mosaic_0001>

<bundles_post_ra>
// kernel: tpu_custom_call.1
= control target key start
LH: loop header
LB: loop body
LE: loop exit
PB: predicated region body
PF: predicated region fallthrough
CT: control target
= control target key end

     0   :  { %s1671_s0 = inlined_call_operand.vmem [shape: bf16[1,8,32], index: 0, kind: input, shape index: {}]   ;;  %s1672_s1 = inlined_call_operand.vmem [shape: bf16[1,8,32], index: 1, kind: input, shape index: {}]   ;;  %s1673_s2 = inlined_call_operand.vmem [shape: bf16[1,8,32], index: 2, kind: input, shape index: {}]   ;;  %s1674_s3 = inlined_call_operand.vmem [shape: bf16[4,32,8], index: 3, kind: input, shape index: {}]   ;;  %s1675_s4 = inlined_call_operand.vmem [shape: f32[4,1,8], index: 4, kind: input, shape index: {}]   ;;  %s1676_s5 = inlined_call_operand.vmem [shape: bf16[4,32,8], index: 5, kind: input, shape index: {}]   ;;  %s1677_s6 = inlined_call_operand.vmem [shape: f32[4,1,8], index: 6, kind: input, shape index: {}]   ;;  %s1678_s7 = inlined_call_operand.vmem [shape: bf16[4,32,8], index: 7, kind: input, shape index: {}]   ;;  %s1679_s8 = inlined_call_operand.vmem [shape: f32[4,1,8], index: 8, kind: input, shape index: {}]   ;;  %s1680_s9 = inlined_call_operand.vmem [shape: bf16[4,8,32], index: 9, kind: input, shape index: {}]   ;;  %s1681_s10 = inlined_call_operand.vmem [shape: f32[1,32], index: 10, kind: input, shape index: {}]   ;;  %s1682_s11 = inlined_call_operand.vmem [shape: f32[1,32], index: 11, kind: input, shape index: {}]   ;;  %s1683_s12 = inlined_call_operand.vmem [shape: f32[1,32], index: 12, kind: input, shape index: {}]   ;;  %s1684_s13 = inlined_call_operand.hbm [shape: f32[1,8,32], index: 13, kind: output, shape index: {0}]   ;;  %s1685_s14 = inlined_call_operand.hbm [shape: f32[1,4,8,8], index: 14, kind: output, shape index: {1}]  }
   0x1   :  { %1700 = sst [smem:[#allocation19_spill]] %s1674_s3 }
   0x2   :  { %1701 = sst [smem:[#allocation20_spill]] %s1682_s11 }
   0x3   :  { %1702 = sst [smem:[#allocation21_spill]] %s1683_s12 }
   0x4   :  { %1703 = sst [smem:[#allocation22_spill]] %s1684_s13 }
   0x5   :  { %1704 = sst [smem:[#allocation23_spill]] %s1685_s14 }
   0x6   :  { %20 = vsyncpa [#allocation4], 0 }
   0x7   :  { %21 = vsyncpa [#allocation6], 0 }
   0x8   :  { %23 = vsyncpa [#allocation6 + $0x1], 0  ;;  %s1472_s29 = smov 0   ;;  %s1474_s30 = smov 0  }
   0x9   :  { %s1476_s15 = smov 0   ;;  %s1478_s16 = smov 0  }
   0xa   :  { %s1480_s17 = smov 0   ;;  %s1482_s18 = smov 0  }
   0xb LB: > { %1705 = sst [smem:[#allocation9_spill]] %s1372_s29  ;;  %s1141_s19 = sadd.s32 4294967295, %s1392_s18   ;;  %s1392_s18 = sphi %s1482_s18, %s29_s18   ;;  %s1388_s17 = sphi %s1480_s17, %s1735_s17   ;;  %s1384_s16 = sphi %s1478_s16, %s1734_s16   ;;  %s1380_s15 = sphi %s1476_s15, %s1733_s15   ;;  %s1376_s30 = sphi %s1474_s30, %s1732_s30   ;;  %s1372_s29 = sphi %s1472_s29, %s1731_s29  }
   0xc   : > { %1706 = sst [smem:[#allocation10_spill]] %s1376_s30  ;;  %s1142_s20 = sadd.s32 4294967294, %s1392_s18  }
   0xd   : > { %1707 = sst [smem:[#allocation11_spill]] %s1380_s15  ;;  %s41_s21 = sadd.s32 1, %s1388_s17 }
   0xe   : > { %1708 = sst [smem:[#allocation12_spill]] %s1388_s17  ;;  %s412_s22 = sadd.s32 1, %s1380_s15 }
   0xf   : > { %1709 = sst [smem:[#allocation13_spill]] %s1392_s18  ;;  %p42_p0 = scmp.ge.s32.totalorder %s41_s21, 4 }
  0x10   : > { %p422_p1 = scmp.ne.s32.totalorder %s1380_s15, %s1376_s30  ;;  %p1508_p2 = scmp.eq.s32.totalorder %s1141_s19, 3 }
  0x11   : > { %p428_p3 = scmp.ne.s32.totalorder %s1376_s30, %s1372_s29  ;;  %s1737_s21 = smov (%p42_p0, %s41_s21), 0 }
  0x12   : > { %s1710_s23 = scalar_select %p1508_p2, 1, 0 }
  0x13   : > { %1712 = sst [smem:[#allocation15_spill]] %s1737_s21  ;;  %p1518_p4 = por %p1508_p2, %p422_p1 }
  0x14   : > { %1711 = sst [smem:[#allocation14_spill]] %s1710_s23  ;;  %p429_p5 = scmp.eq.s32.totalorder %s1142_s20, 3 }
  0x15   : > { %s1713_s24 = scalar_select %p1518_p4, 1, 0 }
  0x16   : > { %s406_s25 = ssub.s32 %s1388_s17, %s1737_s21  ;;  %p1148_p6 = scmp.ge.s32.totalorder %s1392_s18, 1 }
  0x17   : > { %1714 = sst [smem:[#allocation16_spill]] %s1713_s24  ;;  %p410_p7 = scmp.eq.s32.totalorder %s406_s25, 0 }
  0x18   : > { %p1525_p8 = por %p429_p5, %p428_p3  ;;  %p529_p9 = scmp.lt.s32.totalorder %s1392_s18, 5 }
  0x19   : > { %s1531_s27 = scalar_select %p410_p7, %s1380_s15, %s412_s22  }
  0x1a   : > { %s1715_s26 = scalar_select %p1525_p8, 1, 0 }
  0x1b   : > { %1717 = sst [smem:[#allocation18_spill]] %s1531_s27  ;;  %p530_p10 = pnand %p1148_p6, %p529_p9 }
  0x1c   : > { %1716 = sst [smem:[#allocation17_spill]] %s1715_s26  ;;  %s1691_s28 = sand.u32 (!%p530_p10), 1, %s1376_s30  }
  0x1d   : > { %533 = sbr.rel (%p530_p10) target bundleno = 1143 (0x477), region = 72  ;;  %p628_p11 = scmp.lt.s32.totalorder (!%p530_p10), %s1384_s16, 3 }
  0x1e   : > { %s1537_s19 = sshll.u32 (!%p530_p10), %s1691_s28, 3  ;;  %s1718_s3 = sld [smem:[#allocation19_spill]] (!%p530_p10) }
  0x1f   : > { %s612_s29 = scalar_lea.vmem (!%p530_p10), [#allocation5], %s1537_s19  ;;  %p1157_p12 = scmp.ne.s32.totalorder (!%p530_p10), %s1384_s16, 0 }
  0x22   : > { %s1540_s20 = scalar_select %p628_p11, %s1384_s16, 3 }
  0x24   : > { %s1195_s22 = sshll.u32 %s1540_s20, 4  ;;  %s643_s13 = scalar_lea.vmem %s1677_s6, %s1540_s20 }
  0x25   : > { %s632_s26 = scalar_lea.vmem %s1718_s3, %s1195_s22  ;;  %s640_s18 = scalar_lea.vmem %s1676_s5, %s1195_s22 }
  0x26   : > { %s1560_s12 = scalar_lea.vmem %s1678_s7, %s1195_s22  ;;  %s651_s25 = scalar_lea.vmem %s1679_s8, %s1540_s20 }
  0x27   : > { %s1156_s17 = sshll.u32 %s1540_s20, 2  ;;  %660 = sbr.rel (%p1157_p12) target bundleno = 46 (0x2e), region = 76 }
  0x28   : > { %s1570_s3 = scalar_lea.vmem %s1680_s9, %s1156_s17 }
  0x2c   : > { %vm661_vm0 = vcmask 261120   ;;  %v1394_v0 = vmov 0.0  }
  0x2d   : > { %662 = vst.msk [vmem:[#allocation2] sm:$0xff] %vm661_vm0, %v1394_v0 }
  0x2e PF: > { %v1199_v1 = vld [vmem:[%s632_s26 + $0x8] sm:$0xff]  ;;  %v1198_v3 = vld [vmem:[%s632_s26] sm:$0xff]  ;;  %vm686_vm1 = vcmask 261120   ;;  %s1719_s24 = scalar_lea.vmem %s1675_s4, %s1540_s20  ;;  %vm777_vm2 = vcmask 64512   ;;  %vm815_vm3 = vcmask 1043456   ;;  %p1188_p13 = scmp.ne.s32.totalorder %s1384_s16, 3 }
  0x2f   : > { %v1201_v2 = vld [vmem:[%s640_s18 + $0x8] sm:$0xff]  ;;  %696 = vmatpush.bf16.msra.mxu0 %v1199_v1  ;;  %v1200_v4 = vld [vmem:[%s640_s18] sm:$0xff]  ;;  %s1721_s11 = sld [smem:[#allocation21_spill]] (!%p1188_p13) }
  0x30   : > { %732 = vmatpush.bf16.msra.mxu1 %v1201_v2  ;;  %v663_v5 = vld [vmem:[%s1671_s0] sm:$0xf]  ;;  %v1203_v18 = vld [vmem:[%s1560_s12 + $0x8] sm:$0xff] }
  0x31   : > { %v664_v6 = vld [vmem:[%s1672_s1] sm:$0xf]  ;;  %768 = vmatpush.bf16.msra.mxu2 %v1203_v18 }
  0x32   : > { %v1269_v7 = vld [vmem:[%s643_s13] ss:$0 sm:$0xff] }
  0x33   : > { %697 = vmatpush.bf16.msra.mxu0 %v1198_v3  ;;  %v1268_v10 = vld [vmem:[%s1719_s24] ss:$0 sm:$0xff] }
  0x34   : > { %733 = vmatpush.bf16.msra.mxu1 %v1200_v4  ;;  %v1202_v19 = vld [vmem:[%s1560_s12] sm:$0xff] }
  0x35   : > { %769 = vmatpush.bf16.msra.mxu2 %v1202_v19  ;;  %v665_v20 = vld [vmem:[%s1673_s2] sm:$0xf] }
  0x36   : > { %1166 = vmatmul.msk.bf16.vlgmr.msra.gmra.mxu0 %vm686_vm1, %v663_v5  ;;  %v1270_v25 = vld [vmem:[%s651_s25] ss:$0 sm:$0xff]  ;;  %s1720_s25 = sld [smem:[#allocation20_spill]] (!%p1188_p13) }
  0x37   : > { %1175 = vmatmul.msk.bf16.vlgmr.msra.gmra.mxu1 %vm686_vm1, %v664_v6  ;;  %v834_v36 = vld [vmem:[%s1570_s3] sm:$0xf] }
  0x38   : > { %1184 = vmatmul.msk.bf16.vlgmr.msra.gmra.mxu2 %vm686_vm1, %v665_v20  ;;  %v839_v37 = vsel %vm815_vm3, %v834_v36, 0  ;;  %v832_v45 = vld [vmem:[#allocation2] sm:$0xff] }
  0x39   : > { %848 = vmatpush.bf16.msrb.mxu1 %v839_v37 }
  0xb3   : > { %v699_v8 = vpop.f32.mrf.mxu0 }
  0xb4   : > { %v735_v9 = vpop.f32.mrf.mxu1  ;;  %v700_v13 = vadd.f32 %v1268_v10, %v699_v8 }
  0xb5   : > { %v736_v11 = vadd.f32 %v1269_v7, %v735_v9 }
  0xb6   : > { %v775_v17 = vpack.c.bf16 %v700_v13, %v700_v13 }
  0xb7   : > { %v776_v12 = vpack.c.bf16 %v736_v11, %v736_v11 }
  0xb9   : > { %v782_v14 = vsel %vm777_vm2, %v776_v12, 0 }
  0xba   : > { %791 = vmatpush.bf16.xpose.msra.mxu3 %v782_v14 }
  0xbb   : > { %v701_v15 = vpop.f32.mrf.mxu0  ;;  %v771_v26 = vpop.f32.mrf.mxu2 }
  0xbc   : > { %v737_v16 = vpop.f32.mrf.mxu1  ;;  %v772_v27 = vadd.f32 %v1270_v25, %v771_v26 }
  0xbe   : > { %v811_v29 = vpack.c.bf16 %v772_v27, %v772_v27 }
  0xc0   : > { %v817_v31 = vsel %vm815_vm3, %v811_v29, 0 }
  0xc1   : > { %1185 = vmatmul.msk.bf16.vlgmr.msra.gmra.mxu3 %vm777_vm2, %v775_v17  ;;  %826 = vmatpush.bf16.msrb.mxu0 %v817_v31 }
  0xc3   : > { %v773_v33 = vpop.f32.mrf.mxu2 }
 0x144   : > { %v793_v21 = vpop.f32.mrf.mxu3 }
 0x145   : > { %v797_v22 = vmul.f32 0.35355338, %v793_v21 }
 0x147   : > { %798 = vst.msk [vmem:[%s612_s29] sm:$0xff] %vm777_vm2, %v797_v22  ;;  %v799_v23 = vsel %vm777_vm2, %v797_v22, -inf }
 0x148   : > { %800 = vmax.xlane.f32.xlu0 %v799_v23 }
 0x14c   : > { %v795_v24 = vpop.f32.mrf.mxu3 }
 0x1bb   : > { %v801_v28 = vpop.xlane.xlu0 %800 }
 0x1bc   : > { %v802_v30 = vsub.f32 %v797_v22, %v801_v28 }
 0x1be   : > { %v803_v32 = vmul.f32 1.442695, %v802_v30 }
 0x1c0   : > { %1271 = vpow2.f32 %v803_v32 }
 0x1c6   : > { %v1272_v34 = vpop.eup %1271 }
 0x1c7   : > { %v805_v35 = vsel %vm777_vm2, %v1272_v34, 0.0 }
 0x1c8   : > { %806 = vadd.xlane.f32.xlu0 %v805_v35 }
 0x23b   : > { %v807_v38 = vpop.xlane.xlu0 %806 }
 0x23c   : > { %1273 = vrcp.f32 %v807_v38 }
 0x242   : > { %v1274_v39 = vpop.eup %1273 }
 0x243   : > { %v809_v40 = vmul.f32 %v1274_v39, %v1272_v34 }
 0x245   : > { %v810_v41 = vpack.c.bf16 %v809_v40, %v809_v40 }
 0x247   : > { %1186 = vmatmul.msk.bf16.vlgmr.msrb.gmra.mxu0 %vm777_vm2, %v810_v41 }
 0x2c4   : > { %v828_v42 = vpop.f32.mrf.mxu0 }
 0x2c5   : > { %v833_v43 = vpack.c.bf16 %v828_v42, %v828_v42 }
 0x2c7   : > { %1187 = vmatmul.msk.bf16.vlgmr.msrb.gmra.mxu1 %vm777_vm2, %v833_v43 }
 0x2cc   : > { %v830_v44 = vpop.f32.mrf.mxu0 }
 0x344   : > { %v850_v46 = vpop.f32.mrf.mxu1 }
 0x345   : > { %v854_v47 = vadd.f32 %v850_v46, %v832_v45 }
 0x347   : > { %855 = vst.msk [vmem:[#allocation2] sm:$0xff] %vm686_vm1, %v854_v47 }
 0x348   : > { %859 = sbr.rel (%p1188_p13) target bundleno = 1118 (0x45e), region = 80 }
 0x34c   : > { %v852_v48 = vpop.f32.mrf.mxu1 }
 0x34d   : > { %v1275_v50 = vld [vmem:[%s1681_s10] ss:$0 sm:$0xff]  ;;  %v1395_v53 = vmov 32.0  }
 0x34e   : > { %v860_v49 = vld [vmem:[#allocation2] sm:$0xff]  ;;  %1278 = vrcp.f32 %v1395_v53 }
 0x34f   : > { %v865_v51 = vadd.f32 %v1275_v50, %v860_v49  ;;  %v1276_v10 = vld [vmem:[%s1720_s25] ss:$0 sm:$0xff] }
 0x350   : > { %v1277_v12 = vld [vmem:[%s1721_s11] ss:$0 sm:$0xff] }
 0x351   : > { %v866_v52 = vsel %vm686_vm1, %v865_v51, 0.0 }
 0x352   : > { %867 = vadd.xlane.f32.xlu0 %v866_v52 }
 0x354   : > { %v1279_v54 = vpop.eup %1278 }
 0x355   : > { %v870_v55 = vmul.f32 32.0, %v1279_v54  ;;  %vm874_vm4 = vweird.f32 %v1279_v54 }
 0x357   : > { %v871_v56 = vsub.f32 1.0, %v870_v55 }
 0x359   : > { %v872_v57 = vmul.f32 %v1279_v54, %v871_v56 }
 0x35b   : > { %v873_v58 = vadd.f32 %v1279_v54, %v872_v57 }
 0x35d   : > { %v875_v59 = vsel %vm874_vm4, %v1279_v54, %v873_v58 }
 0x3c5   : > { %v868_v60 = vpop.xlane.xlu0 %867 }
 0x3c6   : > { %v876_v61 = vmul.f32 %v875_v59, %v868_v60 }
 0x3c8   : > { %v877_v62 = vsub.f32 %v865_v51, %v876_v61 }
 0x3ca   : > { %v878_v63 = vmul.f32 %v877_v62, %v877_v62 }
 0x3cc   : > { %v879_v0 = vsel %vm686_vm1, %v878_v63, 0.0 }
 0x3cd   : > { %880 = vadd.xlane.f32.xlu0 %v879_v0 }
 0x440   : > { %v881_v1 = vpop.xlane.xlu0 %880 }
 0x441   : > { %v882_v2 = vmul.f32 %v881_v1, %v875_v59 }
 0x443   : > { %v883_v3 = vadd.f32 1e-06, %v882_v2 }
 0x445   : > { %1280 = vrsqrt.f32 %v883_v3  ;;  %vm890_vm6 = vweird.f32 %v883_v3 }
 0x44b   : > { %v1281_v4 = vpop.eup %1280 }
 0x44c   : > { %v885_v5 = vmul.f32 %v1281_v4, %v883_v3  ;;  %vm891_vm5 = vweird.f32 %v1281_v4 }
 0x44d   : > { %vm892_vm7 = vmor %vm890_vm6, %vm891_vm5 }
 0x44e   : > { %v886_v6 = vmul.f32 %v1281_v4, %v885_v5 }
 0x450   : > { %v887_v7 = vmul.f32 0.5, %v886_v6 }
 0x452   : > { %v888_v8 = vsub.f32 1.5, %v887_v7 }
 0x454   : > { %v889_v9 = vmul.f32 %v1281_v4, %v888_v8 }
 0x456   : > { %v893_v11 = vsel %vm892_vm7, %v1281_v4, %v889_v9 }
 0x457   : > { %v894_v13 = vmul.f32 %v893_v11, %v877_v62 }
 0x459   : > { %v899_v14 = vmul.f32 %v1276_v10, %v894_v13 }
 0x45b   : > { %v904_v15 = vadd.f32 %v1277_v12, %v899_v14 }
 0x45d   : > { %905 = vst.msk [vmem:[#allocation3] sm:$0xff] %vm686_vm1, %v904_v15 }
 0x45e PF: > { %s1396_s14 = smov [#allocation3]   ;;  %s1723_s17 = sld [smem:[#allocation10_spill]] }
 0x45f   : > { %s920_s18 = sshll.u32 %s1396_s14, 4  ;;  %s1724_s13 = sld [smem:[#allocation22_spill]]  ;;  %s921_s18 = int_to_ptr.vmem [resolvable:$true] %s920_s18 }
 0x460   : > { %s1191_s22 = sshll.u32 %s1384_s16, 3  ;;  %s1726_s20 = sld [smem:[#allocation23_spill]] }
 0x461   : > { %s937_s25 = sshll.u32 %s612_s29, 4  ;;  %s938_s25 = int_to_ptr.vmem [resolvable:$true] %s937_s25 }
 0x464   : > { %s1727_s27 = sand.u32 1, %s1723_s17  }
 0x465   : > { %s922_s28 = sshll.u32 %s1724_s13, 4  ;;  %s907_s11 = scalar_lea.sflag [#allocation6], %s1727_s27  ;;  %s923_s28 = int_to_ptr.hbm [resolvable:$true] %s922_s28 }
 0x466   : > { %1205 = dma.vmem_to_hbm [thread:$0]  (%p1508_p2), %s921_s18, 128, %s923_s28, [#allocation4]  }
 0x467   : > { %s935_s21 = scalar_lea.hbm %s1726_s20, %s1191_s22  ;;  %s1330_s24 = scalar_lea.hbm %s1726_s20, 32 }
 0x468   : > { %s939_s15 = sshll.u32 %s935_s21, 4  ;;  %s940_s15 = int_to_ptr.hbm [resolvable:$true] %s939_s15 }
 0x469   : > { %s1324_s14 = sshra.s32 %s940_s15, 4  ;;  %s1325_s14 = int_to_ptr.hbm [resolvable:$true] %s1324_s14 }
 0x46a   : > { %s1326_s23 = scalar_lea.hbm %s1325_s14, 8  ;;  %p1331_p5 = scmp.lt.s32.totalorder %s1325_s14, %s1726_s20 }
 0x46b   : > { %p1327_p0 = scmp.ne.s32.totalorder %s1325_s14, %s1326_s23  ;;  %p1332_p6 = scmp.lt.s32.totalorder %s1330_s24, %s1326_s23 }
 0x46d   : > { %p1328_p1 = pnand %p1327_p0, %p1518_p4  ;;  %p1333_p7 = por %p1332_p6, %p1331_p5 }
 0x46f   : > { %p1329_p3 = pneg %p1328_p1 }
 0x471   : > { %p1334_p9 = pnand %p1333_p7, %p1329_p3 }
 0x473   : > { %1337 = shalt.err (!%p1334_p9)
}
 0x474   : > { %1206 = dma.vmem_to_hbm [thread:$0]  (%p1518_p4), %s938_s25, 128, %s940_s15, %s907_s11  }
 0x475   : > { %1363 = dma.done.wait (%p1508_p2), [#allocation4], 128  }
 0x476   : > { %1365 = vsyncadd (%p1508_p2), [#allocation4], 4294967168 }
 0x477 PF: > { %s1728_s19 = sld [smem:[#allocation13_spill]] }
 0x478   : > { %s1729_s29 = sld [smem:[#allocation9_spill]] }
 0x47d   : > { %p1216_p10 = scmp.ge.s32.totalorder %s1728_s19, 2 }
 0x47e   : > { %s956_s22 = sand.u32 1, %s1729_s29  }
 0x47f   : > { %p1211_p11 = pnand %p1216_p10, %p1525_p8  ;;  %s957_s3 = scalar_lea.sflag [#allocation6], %s956_s22 }
 0x481   : > { %p1212_p12 = pneg %p1211_p11 }
 0x483   : > { %1367 = dma.done.wait (%p1212_p12), %s957_s3, 128  }
 0x484   : > { %1369 = vsyncadd (%p1212_p12), %s957_s3, 4294967168  ;;  %s29_s18 = sadd.s32 1, %s1728_s19   ;;  %s1731_s29 = sld [smem:[#allocation10_spill]] }
 0x485   : > { %p26_p4 = scmp.ge.s32.totalorder %s29_s18, 6   ;;  %s1732_s30 = sld [smem:[#allocation11_spill]] }
 0x486   : > { %s1733_s15 = sld [smem:[#allocation18_spill]] }
 0x487   : > { %s1734_s16 = sld [smem:[#allocation12_spill]]  ;;  %28 = sbr.rel (!%p26_p4) target bundleno = 11 (0xb), region = 152 }
 0x488   : > { %s1735_s17 = sld [smem:[#allocation15_spill]] }
 0x48c   :  { %963 = vsyncpa [#allocation4], 1 }
 0x48d   :  { %965 = vsyncpa [#allocation4 + $0x1], 1 }
 0x48e   :  { %966 = vsyncpa [#allocation6], 1 }
 0x48f   :  { %968 = vsyncpa [#allocation6 + $0x1], 1 }

</bundles_post_ra>
